<compile_context>
chip_gen: v7x
topology: tpu7x:2x2x1
jax: 0.10.0
libtpu: 0.0.40
codegen_flags: <defaults>
</compile_context>

<pallas_src>
import jax
import jax.numpy as jnp
from jax.experimental import pallas as pl
from jax.experimental.pallas import tpu as pltpu


def attention_layer_kernel(pos_ref, feat_ref, wqs_ref, wv_ref, out_ref):
    pos = pos_ref[0]        # (C, TN)  NCW tile: channels on sublanes, N on lanes
    feat = feat_ref[0]      # (C, TN)
    wq_sum = wqs_ref[...]   # (C, 1)   column sums of Wq (q is only used via its channel sum)
    wv = wv_ref[...]        # (C, C)   Conv1d weight (C_out, C_in), used untransposed

    # s[n] = sum_cout q[cout, n] = sum_cin (sum_cout Wq[cout, cin]) * pos[cin, n]
    s = jnp.sum(pos * wq_sum, axis=0, keepdims=True)              # (1, TN)

    # energy[j, n] = s[n] * pos[j, n]
    energy = s * pos                                              # (C, TN)
    denom = jnp.sum(energy, axis=0, keepdims=True)                # (1, TN)
    energy = energy * (1.0 / (1e-9 + denom))                      # divide once per lane

    # softmax over the channel (sublane) axis, stable in f32
    e_max = jnp.max(energy, axis=0, keepdims=True)
    e_exp = jnp.exp(energy - e_max)
    attn = e_exp * (1.0 / jnp.sum(e_exp, axis=0, keepdims=True))  # (C, TN)

    # v_conv(feature): (C_out, C_in) @ (C_in, TN) on the MXU
    v = jnp.dot(wv, feat, preferred_element_type=jnp.float32)     # (C, TN)

    out_ref[0] = (attn * v + feat).astype(out_ref.dtype)


def _pick_tn(N, C, itemsize=4):
    """Largest lane tile: a multiple of 128 dividing N, within a conservative
    VMEM budget (3 activation tiles x 2 pipeline buffers). Falls back to the
    full N when N is not 128-aligned (e.g. small test shapes)."""
    if N % 128 != 0:
        return N
    budget = 8 * 1024 * 1024
    tn = 128
    while (tn * 2 <= 2048 and N % (tn * 2) == 0
           and 6 * (tn * 2) * C * itemsize <= budget):
        tn *= 2
    return tn


def layer_forward(feature, position, w_q, w_v):
    """feature, position: (B, C, N) float32 (NCW, same as the PyTorch module).
    w_q, w_v: Conv1d(C, C, 1, bias=False) weights, shape (C_out, C_in)."""
    B, C, N = feature.shape
    TN = _pick_tn(N, C)

    # q is only consumed via its channel sum -> fold Wq into a column-sum vector.
    wq_sum = jnp.sum(w_q, axis=0).reshape(C, 1).astype(jnp.float32)

    return pl.pallas_call(
        attention_layer_kernel,
        out_shape=jax.ShapeDtypeStruct((B, C, N), feature.dtype),
        grid_spec=pltpu.PrefetchScalarGridSpec(
            num_scalar_prefetch=0,
            grid=(B, N // TN),
            in_specs=[
                pl.BlockSpec((1, C, TN), lambda b, n: (b, 0, n)),   # position tile
                pl.BlockSpec((1, C, TN), lambda b, n: (b, 0, n)),   # feature tile
                pl.BlockSpec((C, 1), lambda b, n: (0, 0)),          # Wq column sums (resident)
                pl.BlockSpec((C, C), lambda b, n: (0, 0)),          # Wv (resident)
            ],
            out_specs=pl.BlockSpec((1, C, TN), lambda b, n: (b, 0, n)),
        ),
        compiler_params=pltpu.CompilerParams(
            dimension_semantics=("parallel", "parallel")),
    )(position, feature, wq_sum, w_v)


def _reference(feature, position, w_q, w_v):
    """Pure-JAX reference mirroring the PyTorch forward, for validation."""
    q = jnp.einsum("oc,bcn->bon", w_q, position)                  # q_conv(position)  (B,C,N)
    x_q = jnp.transpose(q, (0, 2, 1))[:, :, :, None]              # (B,N,C,1)
    x_k = jnp.transpose(position, (0, 2, 1))[:, :, None, :]       # (B,N,1,C)
    x_v = jnp.einsum("oc,bcn->bon", w_v, feature)                 # v_conv(feature)   (B,C,N)
    energy = jnp.matmul(x_q, x_k)                                 # (B,N,C,C)
    energy = jnp.sum(energy, axis=-2)                             # (B,N,C)
    energy = energy / (1e-9 + jnp.sum(energy, axis=-1, keepdims=True))
    attention = jax.nn.softmax(jnp.transpose(energy, (0, 2, 1)), axis=1)  # (B,C,N)
    return attention * x_v + feature


if __name__ == "__main__":
    B, C, N = 2, 4, 16
    key = jax.random.PRNGKey(0)
    k1, k2, k3, k4 = jax.random.split(key, 4)

    feature = jax.random.normal(k1, (B, C, N), dtype=jnp.float32)
    position = jax.random.normal(k2, (B, C, N), dtype=jnp.float32)
    # Conv1d(channels, channels, 1, bias=False) weights: (C_out, C_in)
    w_q = 0.1 * jax.random.normal(k3, (C, C), dtype=jnp.float32)
    w_v = 0.1 * jax.random.normal(k4, (C, C), dtype=jnp.float32)

    out = jax.block_until_ready(layer_forward(feature, position, w_q, w_v))

    ref = _reference(feature, position, w_q, w_v)
    assert out.shape == (B, C, N)
    assert jnp.allclose(out, ref, atol=1e-5, rtol=1e-5), "mismatch vs reference"

    print("KERNEL_OK")
</pallas_src>

<mosaic_0001>
module attributes {stable_mosaic.version = 11 : i64} {
  func.func @attention_layer_kernel(%arg0: i32, %arg1: i32, %arg2: memref<1x4x16xf32, #tpu.memory_space<vmem>>, %arg3: memref<1x4x16xf32, #tpu.memory_space<vmem>>, %arg4: memref<4x1xf32, #tpu.memory_space<vmem>>, %arg5: memref<4x4xf32, #tpu.memory_space<vmem>>, %arg6: memref<1x4x16xf32, #tpu.memory_space<vmem>>) attributes {dimension_semantics = [#tpu.dimension_semantics<parallel>, #tpu.dimension_semantics<parallel>], iteration_bounds = array<i64: 2, 1>, scalar_prefetch = 0 : i64, scratch_operands = 0 : i64, tpu.core_type = #tpu.core_type<tc>, window_params = [{transform_indices = @transform_0, window_bounds = array<i64: 1, 4, 16>}, {transform_indices = @transform_1, window_bounds = array<i64: 1, 4, 16>}, {pipeline_mode = #tpu.pipeline_mode<synchronous>, transform_indices = @transform_2, window_bounds = array<i64: 4, 1>}, {pipeline_mode = #tpu.pipeline_mode<synchronous>, transform_indices = @transform_3, window_bounds = array<i64: 4, 4>}, {transform_indices = @transform_4, window_bounds = array<i64: 1, 4, 16>}]} {
    %c0 = arith.constant 0 : index
    %c0_0 = arith.constant 0 : index
    %c0_1 = arith.constant 0 : index
    %0 = vector.load %arg2[%c0, %c0_0, %c0_1] : memref<1x4x16xf32, #tpu.memory_space<vmem>>, vector<1x4x16xf32>
    %1 = vector.shape_cast %0 : vector<1x4x16xf32> to vector<4x16xf32>
    %c0_2 = arith.constant 0 : index
    %c0_3 = arith.constant 0 : index
    %c0_4 = arith.constant 0 : index
    %2 = vector.load %arg3[%c0_2, %c0_3, %c0_4] : memref<1x4x16xf32, #tpu.memory_space<vmem>>, vector<1x4x16xf32>
    %3 = vector.shape_cast %2 : vector<1x4x16xf32> to vector<4x16xf32>
    %c0_5 = arith.constant 0 : index
    %c0_6 = arith.constant 0 : index
    %4 = vector.load %arg4[%c0_5, %c0_6] : memref<4x1xf32, #tpu.memory_space<vmem>>, vector<4x1xf32>
    %c0_7 = arith.constant 0 : index
    %c0_8 = arith.constant 0 : index
    %5 = vector.load %arg5[%c0_7, %c0_8] : memref<4x4xf32, #tpu.memory_space<vmem>>, vector<4x4xf32>
    %6 = vector.broadcast %4 : vector<4x1xf32> to vector<4x16xf32>
    %7 = arith.mulf %1, %6 : vector<4x16xf32>
    %cst = arith.constant dense<0.000000e+00> : vector<16xf32>
    %8 = vector.multi_reduction <add>, %7, %cst [0] : vector<4x16xf32> to vector<16xf32>
    %9 = vector.shape_cast %8 : vector<16xf32> to vector<1x16xf32>
    %10 = vector.broadcast %9 : vector<1x16xf32> to vector<4x16xf32>
    %11 = arith.mulf %10, %1 : vector<4x16xf32>
    %cst_9 = arith.constant dense<0.000000e+00> : vector<16xf32>
    %12 = vector.multi_reduction <add>, %11, %cst_9 [0] : vector<4x16xf32> to vector<16xf32>
    %13 = vector.shape_cast %12 : vector<16xf32> to vector<1x16xf32>
    %cst_10 = arith.constant 9.99999971E-10 : f32
    %14 = vector.broadcast %cst_10 : f32 to vector<1x16xf32>
    %15 = arith.addf %14, %13 : vector<1x16xf32>
    %cst_11 = arith.constant 1.000000e+00 : f32
    %16 = vector.broadcast %cst_11 : f32 to vector<1x16xf32>
    %17 = arith.divf %16, %15 : vector<1x16xf32>
    %18 = vector.broadcast %17 : vector<1x16xf32> to vector<4x16xf32>
    %19 = arith.mulf %11, %18 : vector<4x16xf32>
    %cst_12 = arith.constant dense<0xFF800000> : vector<16xf32>
    %20 = vector.multi_reduction <maximumf>, %19, %cst_12 [0] : vector<4x16xf32> to vector<16xf32>
    %21 = vector.shape_cast %20 : vector<16xf32> to vector<1x16xf32>
    %22 = vector.broadcast %21 : vector<1x16xf32> to vector<4x16xf32>
    %23 = arith.subf %19, %22 : vector<4x16xf32>
    %24 = math.exp %23 : vector<4x16xf32>
    %cst_13 = arith.constant dense<0.000000e+00> : vector<16xf32>
    %25 = vector.multi_reduction <add>, %24, %cst_13 [0] : vector<4x16xf32> to vector<16xf32>
    %26 = vector.shape_cast %25 : vector<16xf32> to vector<1x16xf32>
    %cst_14 = arith.constant 1.000000e+00 : f32
    %27 = vector.broadcast %cst_14 : f32 to vector<1x16xf32>
    %28 = arith.divf %27, %26 : vector<1x16xf32>
    %29 = vector.broadcast %28 : vector<1x16xf32> to vector<4x16xf32>
    %30 = arith.mulf %24, %29 : vector<4x16xf32>
    %cst_15 = arith.constant dense<0.000000e+00> : vector<4x16xf32>
    %31 = tpu.matmul %5, %3, %cst_15 {dimension_numbers = #tpu.dot_dimension_numbers<[1], [0], [0], [1], [0, 0, 1, 1], [], []>} : vector<4x4xf32>, vector<4x16xf32>, vector<4x16xf32> -> vector<4x16xf32>
    %32 = arith.mulf %30, %31 : vector<4x16xf32>
    %33 = arith.addf %32, %3 : vector<4x16xf32>
    %c0_16 = arith.constant 0 : index
    %c0_17 = arith.constant 0 : index
    %c0_18 = arith.constant 0 : index
    %34 = vector.load %arg6[%c0_16, %c0_17, %c0_18] : memref<1x4x16xf32, #tpu.memory_space<vmem>>, vector<1x4x16xf32>
    %35 = vector.shape_cast %34 : vector<1x4x16xf32> to vector<4x16xf32>
    %36 = vector.shape_cast %33 : vector<4x16xf32> to vector<1x4x16xf32>
    tpu.vector_store %arg6[%c0_16, %c0_17, %c0_18], %36 {strides = array<i32>} : memref<1x4x16xf32, #tpu.memory_space<vmem>>, vector<1x4x16xf32>,
    return
  }
  func.func @transform_0(%arg0: i32, %arg1: i32) -> (i32, i32, i32) {
    %c0_i32 = arith.constant 0 : i32
    %c0_i32_0 = arith.constant 0 : i32
    return %arg0, %c0_i32, %arg1 : i32, i32, i32
  }
  func.func @transform_1(%arg0: i32, %arg1: i32) -> (i32, i32, i32) {
    %c0_i32 = arith.constant 0 : i32
    %c0_i32_0 = arith.constant 0 : i32
    return %arg0, %c0_i32, %arg1 : i32, i32, i32
  }
  func.func @transform_2(%arg0: i32, %arg1: i32) -> (i32, i32) {
    %c0_i32 = arith.constant 0 : i32
    %c0_i32_0 = arith.constant 0 : i32
    %c0_i32_1 = arith.constant 0 : i32
    return %c0_i32, %c0_i32_0 : i32, i32
  }
  func.func @transform_3(%arg0: i32, %arg1: i32) -> (i32, i32) {
    %c0_i32 = arith.constant 0 : i32
    %c0_i32_0 = arith.constant 0 : i32
    %c0_i32_1 = arith.constant 0 : i32
    return %c0_i32, %c0_i32_0 : i32, i32
  }
  func.func @transform_4(%arg0: i32, %arg1: i32) -> (i32, i32, i32) {
    %c0_i32 = arith.constant 0 : i32
    %c0_i32_0 = arith.constant 0 : i32
    return %arg0, %c0_i32, %arg1 : i32, i32, i32
  }
}

</mosaic_0001>

<bundles_post_ra>
// kernel: tpu_custom_call.1
= control target key start
LH: loop header
LB: loop body
LE: loop exit
PB: predicated region body
PF: predicated region fallthrough
CT: control target
= control target key end

     0   :  { %9 = vsyncpa [#allocation3], 0  ;;  %s930_s0 = inlined_call_operand.hbm [shape: f32[2,4,16], index: 0, kind: input, shape index: {}]   ;;  %s931_s1 = inlined_call_operand.vmem [shape: f32[2,4,16], index: 1, kind: input, shape index: {}]   ;;  %s932_s2 = inlined_call_operand.vmem [shape: f32[4,1], index: 2, kind: input, shape index: {}]   ;;  %s933_s3 = inlined_call_operand.vmem [shape: f32[4,4], index: 3, kind: input, shape index: {}]   ;;  %s934_s4 = inlined_call_operand.hbm [shape: f32[2,4,16], index: 4, kind: output, shape index: {}]  }
   0x1   :  { %11 = vsyncpa [#allocation3 + $0x1], 0 }
   0x2   :  { %12 = vsyncpa [#allocation4], 0 }
   0x3   :  { %14 = vsyncpa [#allocation4 + $0x1], 0  ;;  %s738_s15 = smov 0   ;;  %s740_s16 = smov 0  }
   0x4   :  { %s742_s17 = smov 0   ;;  %s744_s18 = smov 0  }
   0x5   :  { %s746_s19 = smov 0   ;;  %s748_s20 = smov 0  }
   0x6 LB: > { %s499_s21 = sadd.s32 4294967295, %s706_s20   ;;  %s500_s22 = sadd.s32 4294967294, %s706_s20   ;;  %s706_s20 = sphi %s748_s20, %s20_s20   ;;  %s702_s19 = sphi %s746_s19, %s950_s19   ;;  %s698_s18 = sphi %s744_s18, %s949_s18   ;;  %s694_s17 = sphi %s742_s17, %s948_s17   ;;  %s690_s16 = sphi %s740_s16, %s947_s16   ;;  %s686_s15 = sphi %s738_s15, %s946_s15  }
   0x7   : > { %s32_s23 = sadd.s32 1, %s702_s19  ;;  %s41_s24 = sadd.s32 1, %s694_s17 }
   0x8   : > { %p34_p0 = scmp.ge.s32.totalorder %s32_s23, 2  ;;  %p48_p1 = scmp.ne.s32.totalorder %s694_s17, %s690_s16 }
   0x9   : > { %p49_p2 = scmp.eq.s32.totalorder %s706_s20, 0  ;;  %p54_p3 = scmp.ne.s32.totalorder %s690_s16, %s686_s15 }
   0xa   : > { %s952_s23 = smov (%p34_p0, %s32_s23), 0  ;;  %p55_p5 = scmp.eq.s32.totalorder %s499_s21, 0 }
   0xb   : > { %p779_p4 = por %p49_p2, %p48_p1  ;;  %s36_s26 = ssub.s32 %s702_s19, %s952_s23 }
   0xc   : > { %p150_p6 = scmp.eq.s32.totalorder %s499_s21, 1  ;;  %p39_p7 = scmp.eq.s32.totalorder %s36_s26, 0 }
   0xd   : > { %p785_p8 = por %p55_p5, %p54_p3  ;;  %p156_p10 = scmp.eq.s32.totalorder %s500_s22, 1 }
   0xe   : > { %p789_p9 = por %p150_p6, %p48_p1  ;;  %p534_p13 = scmp.lt.s32.totalorder %s706_s20, 2 }
   0xf   : > { %s794_s29 = scalar_select %p39_p7, %s694_s17, %s41_s24  }
  0x10   : > { %s938_s28 = scalar_select %p789_p9, 1, 0 }
  0x11   : > { %p796_p11 = por %p156_p10, %p54_p3  ;;  %s182_s5 = sand.u32 1, %s694_s17  }
  0x12   : > { %s503_s6 = sshll.u32 %s182_s5, 2  ;;  %s504_s7 = sshll.u32 %s702_s19, 6 }
  0x13   : > { %s939_s30 = scalar_select %p796_p11, 1, 0 }
  0x14   : > { %s807_s10 = scalar_lea.hbm %s930_s0, %s504_s7  ;;  %s186_s11 = scalar_lea.vmem [#allocation2], %s503_s6 }
  0x15   : > { %s194_s12 = sshll.u32 %s186_s11, 4  ;;  %p813_p0 = pnand %p534_p13, %p779_p4  ;;  %s809_s12 = int_to_ptr.vmem [resolvable:$true] %s194_s12 }
  0x16   : > { %s183_s14 = scalar_lea.sflag [#allocation3], %s182_s5  ;;  %s594_s21 = scalar_lea.hbm %s807_s10, 64 }
  0x17   : > { %p595_p3 = scmp.ne.s32.totalorder %s807_s10, %s594_s21  ;;  %p596_p5 = pneg %p813_p0 }
  0x18   : > { %s599_s25 = scalar_lea.hbm %s930_s0, 128  ;;  %p600_p4 = scmp.lt.u32.totalorder %s807_s10, %s930_s0 }
  0x19   : > { %p597_p6 = pnand %p596_p5, %p595_p3  ;;  %p601_p10 = scmp.lt.u32.totalorder %s599_s25, %s594_s21 }
  0x1a   : > { %p603_p12 = scmp.lt.u32.totalorder %s594_s21, %s807_s10 }
  0x1b   : > { %p598_p7 = pneg %p597_p6  ;;  %p602_p13 = por %p601_p10, %p600_p4 }
  0x1d   : > { %p604_p1 = por %p603_p12, %p602_p13 }
  0x1f   : > { %p605_p2 = pnand %p604_p1, %p598_p7 }
  0x21   : > { %608 = shalt.err (!%p605_p2)
}
  0x22   : > { %s609_s5 = scalar_lea.vmem %s809_s12, 64  ;;  %s708_s7 = smov [#allocation2]  }
  0x23   : > { %p610_p3 = scmp.ne.s32.totalorder %s809_s12, %s609_s5  ;;  %s614_s8 = sshll.u32 %s708_s7, 4  ;;  %s615_s8 = int_to_ptr.vmem [resolvable:$false] %s614_s8 }
  0x24   : > { %s616_s9 = scalar_lea.vmem %s615_s8, 128  ;;  %p617_p9 = scmp.lt.s32.totalorder %s809_s12, %s615_s8 }
  0x25   : > { %p612_p6 = pnand %p610_p3, %p596_p5  ;;  %p618_p4 = scmp.lt.s32.totalorder %s616_s9, %s609_s5 }
  0x27   : > { %p613_p11 = pneg %p612_p6  ;;  %p619_p10 = por %p618_p4, %p617_p9 }
  0x29   : > { %p620_p12 = pnand %p619_p10, %p613_p11 }
  0x2b   : > { %623 = shalt.err (!%p620_p12)
}
  0x2c   : > { %529 = dma.hbm_to_vmem [thread:$0]  (!%p813_p0), %s807_s10, 64, %s809_s12, %s183_s14  }
  0x2d   : > { %p941_p1 = scmp.lt.s32.totalorder %s706_s20, 3  ;;  %p942_p2 = scmp.ge.s32.totalorder %s706_s20, 1 }
  0x2f   : > { %p210_p5 = pnand %p942_p2, %p941_p1 }
  0x30   : > { %s849_s11 = sand.u32 (!%p210_p5), 1, %s690_s16  }
  0x31   : > { %213 = sbr.rel (%p210_p5) target bundleno = 304 (0x130), region = 36  ;;  %s506_s21 = sshll.u32 (!%p210_p5), %s849_s11, 2 }
  0x32   : > { %s216_s22 = scalar_lea.sflag (!%p210_p5), [#allocation3], %s849_s11  ;;  %s219_s13 = scalar_lea.vmem (!%p210_p5), [#allocation2], %s506_s21 }
  0x38   : > { %677 = dma.done.wait (%p785_p8), %s216_s22, 64  }
  0x39   : > { %679 = vsyncadd (%p785_p8), %s216_s22, 4294967232  ;;  %p251_p9 = scmp.lt.s32.totalorder %s698_s18, 1  ;;  %v709_v0 = vmov 0   ;;  %v710_v1 = vmov 0.0   ;;  %vm711_vm0 = vmmov 0   ;;  %vm312_vm1 = vcmask 1043456  }
  0x3a   : > { %587 = vset.pattern.permute.xlu0 %v709_v0  ;;  %517 = vmatprep.subr.mxu0 %v710_v1  ;;  %vm308_vm2 = vcmask 31744   ;;  %v260_v2 = vld [vmem:[%s932_s2] sm:$0xf]  ;;  %vm268_vm3 = vcmask 125952   ;;  %s512_s7 = sshll.u32 %s698_s18, 6  ;;  %s250_s8 = scalar_lea.vmem [#allocation5], %s506_s21 }
  0x3b   : > { %s252_s10 = scalar_select %p251_p9, %s698_s18, 1  ;;  %519 = vmatprep.mubr.msk.f32.mxu0 %vm711_vm0, %v710_v1  ;;  %v261_v4 = vld [vmem:[%s933_s3] sm:$0xf]  ;;  %264 = vperm.xlu0 %587, %v260_v2  }
  0x3c   : > { %v258_v5 = vld [vmem:[%s219_s13] sm:$0xf]  ;;  %s404_s9 = sshll.u32 %s250_s8, 4  ;;  %p943_p11 = scmp.ne.s32.totalorder %s938_s28, 0  ;;  %s882_s9 = int_to_ptr.vmem [resolvable:$true] %s404_s9 }
  0x3d   : > { %s508_s12 = sshll.u32 %s252_s10, 2  ;;  %s880_s10 = scalar_lea.hbm %s934_s4, %s512_s7 }
  0x3e   : > { %s257_s25 = scalar_lea.vmem %s931_s1, %s508_s12  ;;  %s390_s12 = scalar_lea.sflag [#allocation4], %s849_s11 }
  0x3f   : > { %v259_v3 = vld [vmem:[%s257_s25] sm:$0xf]  ;;  %s624_s14 = scalar_lea.vmem %s882_s9, 64  ;;  %s712_s18 = smov [#allocation5]  }
  0x40   : > { %518 = vmatpush3.msk.msra.mxu0 %vm312_vm1, %v259_v3  ;;  %p625_p8 = scmp.ne.s32.totalorder %s882_s9, %s624_s14  ;;  %s628_s21 = sshll.u32 %s712_s18, 4  ;;  %s629_s21 = int_to_ptr.vmem [resolvable:$false] %s628_s21 }
  0x41   : > { %520 = vmatmul.mubr.msk.f32.vlgmr.msra.gmra.mrb[0].mxu0 %vm308_vm2, %v261_v4  ;;  %s630_s24 = scalar_lea.vmem %s629_s21, 128  ;;  %p631_p13 = scmp.lt.s32.totalorder %s882_s9, %s629_s21 }
  0x42   : > { %p626_p0 = pnand %p625_p8, %p943_p11  ;;  %p632_p3 = scmp.lt.s32.totalorder %s630_s24, %s624_s14 }
  0x44   : > { %p627_p7 = pneg %p626_p0  ;;  %p633_p6 = por %p632_p3, %p631_p13 }
  0x46   : > { %p634_p4 = pnand %p633_p6, %p627_p7 }
  0xba   : > { %v265_v6 = vpop.permute.xlu0 %264 }
  0xbb   : > { %v267_v7 = vmul.f32 %v265_v6, %v258_v5 }
  0xbd   : > { %v269_v8 = vsel %vm268_vm3, %v267_v7, 0.0 }
  0xbe   : > { %v270_v9 = vrot.slane %v269_v8, 4 }
  0xc0   : > { %v271_v10 = vadd.f32 %v270_v9, %v269_v8 }
  0xc2   : > { %v272_v11 = vrot.slane %v271_v10, 2 }
  0xc4   : > { %v273_v12 = vadd.f32 %v272_v11, %v271_v10 }
  0xc6   : > { %v274_v13 = vrot.slane %v273_v12, 1 }
  0xc8   : > { %v275_v14 = vadd.f32 %v274_v13, %v273_v12 }
  0xca   : > { %v276_v15 = vmul.f32 %v275_v14, %v258_v5 }
  0xcc   : > { %v277_v16 = vsel %vm268_vm3, %v276_v15, 0.0 }
  0xcd   : > { %v278_v17 = vrot.slane %v277_v16, 4 }
  0xcf   : > { %v279_v18 = vadd.f32 %v278_v17, %v277_v16 }
  0xd1   : > { %v280_v19 = vrot.slane %v279_v18, 2 }
  0xd3   : > { %v281_v20 = vadd.f32 %v280_v19, %v279_v18 }
  0xd5   : > { %v282_v21 = vrot.slane %v281_v20, 1 }
  0xd7   : > { %v283_v22 = vadd.f32 %v282_v21, %v281_v20 }
  0xd9   : > { %v284_v23 = vadd.f32 1e-09, %v283_v22 }
  0xdb   : > { %588 = vrcp.f32 %v284_v23 }
  0xe5   : > { %v589_v24 = vpop.eup %588 }
  0xe6   : > { %v287_v25 = vmul.f32 %v589_v24, %v276_v15 }
  0xe8   : > { %v288_v26 = vsel %vm268_vm3, %v287_v25, -inf }
  0xe9   : > { %v289_v27 = vrot.slane %v288_v26, 4 }
  0xeb   : > { %v290_v28 = vmax.f32 %v288_v26, %v289_v27 }
  0xed   : > { %v291_v29 = vrot.slane %v290_v28, 2 }
  0xef   : > { %v292_v30 = vmax.f32 %v290_v28, %v291_v29 }
  0xf1   : > { %v293_v31 = vrot.slane %v292_v30, 1 }
  0xf3   : > { %v294_v32 = vmax.f32 %v292_v30, %v293_v31 }
  0xf5   : > { %v295_v33 = vsub.f32 %v287_v25, %v294_v32 }
  0xf7   : > { %v296_v34 = vmul.f32 1.442695, %v295_v33 }
  0xf9   : > { %590 = vpow2.f32 %v296_v34 }
 0x103   : > { %v591_v35 = vpop.eup %590 }
 0x104   : > { %v298_v36 = vsel %vm268_vm3, %v591_v35, 0.0 }
 0x105   : > { %v299_v37 = vrot.slane %v298_v36, 4 }
 0x107   : > { %v300_v38 = vadd.f32 %v299_v37, %v298_v36 }
 0x109   : > { %v301_v39 = vrot.slane %v300_v38, 2 }
 0x10b   : > { %v302_v40 = vadd.f32 %v301_v39, %v300_v38 }
 0x10d   : > { %v303_v41 = vrot.slane %v302_v40, 1 }
 0x10f   : > { %v304_v42 = vadd.f32 %v303_v41, %v302_v40 }
 0x111   : > { %592 = vrcp.f32 %v304_v42 }
 0x114   : > { %v382_v43 = vpop.f32.mrb[0].mxu0 }
 0x115   : > { %v521_v44 = vpop.f32.mrb[1].mxu0 }
 0x11b   : > { %v593_v45 = vpop.eup %592 }
 0x11c   : > { %v307_v46 = vmul.f32 %v593_v45, %v591_v35 }
 0x11e   : > { %v386_v47 = vmul.f32 %v382_v43, %v307_v46 }
 0x120   : > { %v387_v48 = vadd.f32 %v386_v47, %v259_v3 }
 0x122   : > { %388 = vst.msk [vmem:[%s250_s8] sm:$0xf] %vm268_vm3, %v387_v48 }
 0x123   : > { %637 = shalt.err (!%p634_p4)
}
 0x124   : > { %s638_s11 = scalar_lea.hbm %s880_s10, 64  ;;  %s642_s27 = scalar_lea.hbm %s934_s4, 128 }
 0x125   : > { %p639_p10 = scmp.ne.s32.totalorder %s880_s10, %s638_s11  ;;  %p643_p2 = scmp.lt.u32.totalorder %s880_s10, %s934_s4 }
 0x126   : > { %p644_p5 = scmp.lt.u32.totalorder %s642_s27, %s638_s11  ;;  %p646_p8 = scmp.lt.u32.totalorder %s638_s11, %s880_s10 }
 0x127   : > { %p640_p12 = pnand %p639_p10, %p943_p11 }
 0x128   : > { %p645_p9 = por %p644_p5, %p643_p2 }
 0x129   : > { %p641_p1 = pneg %p640_p12 }
 0x12a   : > { %p647_p0 = por %p646_p8, %p645_p9 }
 0x12c   : > { %p648_p7 = pnand %p647_p0, %p641_p1 }
 0x12e   : > { %651 = shalt.err (!%p648_p7)
}
 0x12f   : > { %524 = dma.vmem_to_hbm [thread:$0]  (%p943_p11), %s882_s9, 64, %s880_s10, %s390_s12  }
 0x130 PF: > { %s416_s7 = sand.u32 1, %s686_s15   ;;  %p944_p13 = scmp.ne.s32.totalorder %s939_s30, 0 }
 0x131   : > { %p945_p3 = scmp.ge.s32.totalorder %s706_s20, 2  ;;  %s417_s8 = scalar_lea.sflag [#allocation4], %s416_s7 }
 0x133   : > { %p531_p6 = pnand %p945_p3, %p944_p13 }
 0x135   : > { %681 = dma.done.wait (!%p531_p6), %s417_s8, 64  }
 0x136   : > { %683 = vsyncadd (!%p531_p6), %s417_s8, 4294967232  ;;  %s20_s20 = sadd.s32 1, %s706_s20   ;;  %s946_s15 = smov %s690_s16 }
 0x137   : > { %p17_p4 = scmp.ge.s32.totalorder %s20_s20, 4   ;;  %s947_s16 = smov %s694_s17 }
 0x138   : > { %s948_s17 = smov %s794_s29  ;;  %s949_s18 = smov %s702_s19 }
 0x139   : > { %s950_s19 = smov %s952_s23  ;;  %19 = sbr.rel (!%p17_p4) target bundleno = 6 (0x6), region = 84 }
 0x140   :  { %422 = vsyncpa [#allocation3], 1 }
 0x141   :  { %424 = vsyncpa [#allocation3 + $0x1], 1 }
 0x142   :  { %425 = vsyncpa [#allocation4], 1 }
 0x143   :  { %427 = vsyncpa [#allocation4 + $0x1], 1 }

</bundles_post_ra>
